<compile_context>
chip_gen: v7x
topology: tpu7x:2x2x1
jax: 0.10.0
libtpu: 0.0.40
codegen_flags: <defaults>
</compile_context>

<pallas_src>
import math

import jax
import jax.numpy as jnp
from jax.experimental import pallas as pl
from jax.experimental.pallas import tpu as pltpu


def _nbytes(shape, dtype):
    return int(math.prod(shape)) * jnp.dtype(dtype).itemsize


def _invariant_spec(block_shape, index_map):
    """Grid-invariant block: DMA'd once; single-buffered when supported."""
    try:
        return pl.BlockSpec(block_shape, index_map, pipeline_mode=pl.Buffered(1))
    except (TypeError, AttributeError):
        return pl.BlockSpec(block_shape, index_map)


# ---------------------------------------------------------------------------
# Kernel: per (batch, q-tile, head-group) step.
# ---------------------------------------------------------------------------
def _make_mha_kernel(heads_per_group, head_dim, q_tile, with_qk, exp_dtype):
    G, hd = heads_per_group, head_dim
    ghd = G * hd
    # Contract the last dims of q and k: q @ k^T without an explicit transpose.
    trans_b = (((1,), (1,)), ((), ()))

    def kernel(x_ref, wq_ref, bq_ref, wkv_ref, bkv_ref, wo_ref, bo_ref, *refs):
        if with_qk:
            out_ref, qk_ref, acc_ref, kv_ref = refs
        else:
            out_ref, acc_ref, kv_ref = refs
            qk_ref = None

        qt = pl.program_id(1)
        g = pl.program_id(2)
        n_g = wq_ref.shape[0]
        gi = 0 if n_g == 1 else g          # static index when single group
        cd = x_ref.dtype
        T = x_ref.shape[1]

        # --- K/V projection for this head group: once per batch (first q-tile),
        #     cached in VMEM and reused by every query tile of this batch.
        @pl.when(qt == 0)
        def _():
            x_full = x_ref[0]                                         # (T, D)
            kv = jnp.dot(x_full, wkv_ref[gi],
                         preferred_element_type=jnp.float32)          # (T, 2*ghd)
            kv = kv + bkv_ref[gi].astype(jnp.float32)                 # K bias slot = 0
            kv_ref[gi] = kv.astype(cd)

        # --- Q projection for this query tile (hd**-0.5 folded into packed W).
        if q_tile == T:
            xq = x_ref[0]                                             # (T, D)
        else:
            row0 = pl.multiple_of(qt * q_tile, q_tile)
            xq = x_ref[0, pl.ds(row0, q_tile), :]                     # (tq, D)
        q = jnp.dot(xq, wq_ref[gi], preferred_element_type=jnp.float32)
        q = (q + bq_ref[gi].astype(jnp.float32)).astype(cd)           # (tq, ghd)

        kv = kv_ref[gi]                                               # (T, 2*ghd)

        @pl.when(g == 0)
        def _():
            acc_ref[...] = jnp.zeros_like(acc_ref)

        ctxs = []
        for j in range(G):                   # small static unroll (G <= 8)
            lo = j * hd
            qj = q[:, lo:lo + hd]                                     # (tq, hd)
            kj = kv[:, lo:lo + hd]                                    # (T, hd)
            vj = kv[:, ghd + lo:ghd + lo + hd]                        # (T, hd)

            s = jax.lax.dot_general(qj, kj, trans_b,
                                    preferred_element_type=jnp.float32)  # (tq, T)
            if with_qk:
                qk_ref[0, j] = s.astype(qk_ref.dtype)

            m = jnp.max(s, axis=-1, keepdims=True)
            p = jnp.exp((s - m).astype(exp_dtype))                    # EUP (bf16 on v6e/v7x)
            denom = jnp.sum(p.astype(jnp.float32), axis=-1, keepdims=True)
            r = pl.reciprocal(denom, approx=True)                     # EUP slot
            # Normalize the (tq, hd) context instead of the (tq, T) weights.
            ctx = jnp.dot(p.astype(cd), vj,
                          preferred_element_type=jnp.float32) * r     # (tq, hd)
            ctxs.append(ctx.astype(cd))

        wv_g = ctxs[0] if G == 1 else jnp.concatenate(ctxs, axis=-1)  # (tq, ghd)
        # Partial output projection with K = G*hd (MXU-friendly) accumulated
        # in f32 across head groups (no per-head K = hd matmuls).
        acc_ref[...] += jnp.dot(wv_g, wo_ref[gi],
                                preferred_element_type=jnp.float32)

        @pl.when(g == n_g - 1)
        def _():
            out_ref[0] = (acc_ref[...]
                          + bo_ref[...].astype(jnp.float32)).astype(out_ref.dtype)

    return kernel


# ---------------------------------------------------------------------------
# One-time weight packing (hoist this out of the per-call path).
# ---------------------------------------------------------------------------
def pack_mha_params(params, n_head, *, compute_dtype=jnp.bfloat16,
                    heads_per_group=None):
    D = params["wq"].shape[0]
    assert D % n_head == 0
    hd = D // n_head
    if heads_per_group is None:
        G = max(1, min(n_head, max(1, 256 // hd), 8))   # aim for G*hd ~ 256
        while n_head % G:
            G -= 1
    else:
        G = heads_per_group
        assert n_head % G == 0
    n_g = n_head // G
    ghd = G * hd
    scale = float(hd) ** (-0.5)          # == (hd**-0.25) applied to q AND k
    cd = jnp.dtype(compute_dtype)

    wq_t = params["wq"].T * scale        # scale folded into Q weights + bias
    wk_t = params["wk"].T
    wv_t = params["wv"].T
    wo_t = params["wo"].T
    bq = params["bq"] * scale
    bv = params["bv"]

    wq_p, bq_p, wkv_p, bkv_p, wo_p = [], [], [], [], []
    for g in range(n_g):
        sl = slice(g * ghd, (g + 1) * ghd)
        wq_p.append(wq_t[:, sl])
        bq_p.append(bq[sl].reshape(1, ghd))
        wkv_p.append(jnp.concatenate([wk_t[:, sl], wv_t[:, sl]], axis=1))
        bkv_p.append(jnp.concatenate(
            [jnp.zeros((ghd,), bv.dtype), bv[sl]]).reshape(1, 2 * ghd))
        wo_p.append(wo_t[sl, :])

    return {
        "wq": jnp.stack(wq_p).astype(cd),     # (n_g, D, ghd)
        "bq": jnp.stack(bq_p).astype(cd),     # (n_g, 1, ghd)
        "wkv": jnp.stack(wkv_p).astype(cd),   # (n_g, D, 2*ghd)
        "bkv": jnp.stack(bkv_p).astype(cd),   # (n_g, 1, 2*ghd)
        "wo": jnp.stack(wo_p).astype(cd),     # (n_g, ghd, D)
        "bo": params["bo"].reshape(1, D).astype(cd),
        "n_head": n_head, "heads_per_group": G, "head_dim": hd,
        "compute_dtype": cd,
    }


# ---------------------------------------------------------------------------
# Forward (packed params).
# ---------------------------------------------------------------------------
def mha_forward_packed(x, packed, *, return_qk=False, qk_dtype=jnp.bfloat16,
                       q_tile=None, softmax_dtype=None):
    """x: (B, T, D). Returns (out (B,T,D) in x.dtype, qk (B,H,T,T) or None)."""
    B, T, D = x.shape
    H = packed["n_head"]
    G = packed["heads_per_group"]
    hd = packed["head_dim"]
    ghd = G * hd
    n_g = H // G
    assert D == H * hd
    cd = packed["compute_dtype"]
    out_dtype = x.dtype
    # NOTE: on v5e (no bf16 VPU/EUP) pass softmax_dtype=jnp.float32.
    exp_dt = jnp.dtype(softmax_dtype) if softmax_dtype is not None else cd

    # Query tile: a multiple of 8 that divides T (else full T).
    if q_tile is None:
        tq = T
        if T > 512:
            for cand in range(512, 7, -8):
                if T % cand == 0:
                    tq = cand
                    break
    else:
        tq = q_tile
        assert T % tq == 0 and (tq % 8 == 0 or tq == T)
    n_qt = T // tq

    x_cd = x.astype(cd)

    in_specs = [
        pl.BlockSpec((1, T, D), lambda b, qt, g: (b, 0, 0)),               # x
        _invariant_spec((n_g, D, ghd), lambda b, qt, g: (0, 0, 0)),        # wq
        _invariant_spec((n_g, 1, ghd), lambda b, qt, g: (0, 0, 0)),        # bq
        _invariant_spec((n_g, D, 2 * ghd), lambda b, qt, g: (0, 0, 0)),    # wkv
        _invariant_spec((n_g, 1, 2 * ghd), lambda b, qt, g: (0, 0, 0)),    # bkv
        _invariant_spec((n_g, ghd, D), lambda b, qt, g: (0, 0, 0)),        # wo
        _invariant_spec((1, D), lambda b, qt, g: (0, 0)),                  # bo
    ]
    out_shapes = [jax.ShapeDtypeStruct((B, T, D), out_dtype)]
    out_specs = [pl.BlockSpec((1, tq, D), lambda b, qt, g: (b, qt, 0))]
    if return_qk:
        out_shapes.append(jax.ShapeDtypeStruct((B, H, T, T), jnp.dtype(qk_dtype)))
        out_specs.append(
            pl.BlockSpec((1, G, tq, T), lambda b, qt, g: (b, g, qt, 0)))

    scratch_shapes = [
        pltpu.VMEM((tq, D), jnp.float32),        # out-projection accumulator
        pltpu.VMEM((n_g, T, 2 * ghd), cd),       # per-group K/V cache
    ]

    # VMEM budget: resident blocks + scratch + in-kernel temporaries, capped by
    # the actual device capacity (v7x has only 64 MiB).
    need = (_nbytes((n_g, D, ghd), cd) + _nbytes((n_g, 1, ghd), cd)
            + _nbytes((n_g, D, 2 * ghd), cd) + _nbytes((n_g, 1, 2 * ghd), cd)
            + _nbytes((n_g, ghd, D), cd) + _nbytes((1, D), cd)
            + 2 * _nbytes((1, T, D), cd)
            + 2 * _nbytes((1, tq, D), out_dtype)
            + _nbytes((tq, D), jnp.float32)
            + _nbytes((n_g, T, 2 * ghd), cd)
            + _nbytes((T, 2 * ghd), jnp.float32)
            + 2 * G * _nbytes((tq, T), jnp.float32)
            + (8 << 20))
    if return_qk:
        need += 2 * _nbytes((1, G, tq, T), qk_dtype)
    try:
        cap = int(pltpu.get_tpu_info().vmem_capacity_bytes * 0.85)
    except Exception:
        cap = 54 << 20                      # conservative fallback (fits v7x)
    vmem_limit = int(min(max(need, 24 << 20), cap))

    flops = int(B * (8 * T * D * D + 4 * T * T * D))
    bytes_accessed = (_nbytes((B, T, D), cd) + _nbytes((B, T, D), out_dtype)
                      + _nbytes((n_g, D, 4 * ghd), cd)
                      + _nbytes((n_g, ghd, D), cd))
    if return_qk:
        bytes_accessed += _nbytes((B, H, T, T), qk_dtype)
    cost = pl.CostEstimate(flops=flops, transcendentals=int(B * H * T * T),
                           bytes_accessed=int(bytes_accessed))

    kernel = _make_mha_kernel(G, hd, tq, return_qk, exp_dt)
    outs = pl.pallas_call(
        kernel,
        out_shape=tuple(out_shapes),
        grid=(B, n_qt, n_g),
        in_specs=in_specs,
        out_specs=tuple(out_specs),
        scratch_shapes=scratch_shapes,
        compiler_params=pltpu.CompilerParams(
            dimension_semantics=("parallel", "arbitrary", "arbitrary"),
            vmem_limit_bytes=vmem_limit),
        cost_estimate=cost,
    )(x_cd, packed["wq"], packed["bq"], packed["wkv"], packed["bkv"],
      packed["wo"], packed["bo"])

    out = outs[0]
    qk = outs[1] if return_qk else None
    return out, qk


def multi_head_attention(x, params, n_head, *, compute_dtype=jnp.bfloat16,
                         **kwargs):
    """Convenience wrapper; real callers should hoist pack_mha_params."""
    packed = pack_mha_params(params, n_head, compute_dtype=compute_dtype)
    return mha_forward_packed(x, packed, **kwargs)


# ---------------------------------------------------------------------------
# Pure-JAX reference (mirrors the PyTorch forward exactly, f32 end to end)
# ---------------------------------------------------------------------------
def mha_reference(x, params, n_head):
    B, T, D = x.shape
    H = n_head
    hd = D // H
    scale = float(hd) ** (-0.25)
    q = x @ params["wq"].T + params["bq"]
    k = x @ params["wk"].T
    v = x @ params["wv"].T + params["bv"]
    qh = q.reshape(B, T, H, hd).transpose(0, 2, 1, 3) * scale        # (B,H,T,hd)
    kh = k.reshape(B, T, H, hd).transpose(0, 2, 3, 1) * scale        # (B,H,hd,T)
    vh = v.reshape(B, T, H, hd).transpose(0, 2, 1, 3)                # (B,H,T,hd)
    qk = (qh @ kh).astype(jnp.float32)                               # (B,H,T,T)
    w = jax.nn.softmax(qk, axis=-1).astype(q.dtype)
    wv = (w @ vh).transpose(0, 2, 1, 3).reshape(B, T, D)
    out = wv @ params["wo"].T + params["bo"]
    return out, qk


if __name__ == "__main__":
    B, T, D, H = 2, 8, 32, 4   # n_batch, n_ctx, n_state, n_head

    key = jax.random.PRNGKey(0)
    ks = jax.random.split(key, 8)
    s = 1.0 / math.sqrt(D)
    params = {
        "wq": jax.random.uniform(ks[0], (D, D), jnp.float32, -s, s),
        "bq": jax.random.uniform(ks[1], (D,), jnp.float32, -s, s),
        "wk": jax.random.uniform(ks[2], (D, D), jnp.float32, -s, s),
        "wv": jax.random.uniform(ks[3], (D, D), jnp.float32, -s, s),
        "bv": jax.random.uniform(ks[4], (D,), jnp.float32, -s, s),
        "wo": jax.random.uniform(ks[5], (D, D), jnp.float32, -s, s),
        "bo": jax.random.uniform(ks[6], (D,), jnp.float32, -s, s),
    }
    x = jax.random.normal(ks[7], (B, T, D), jnp.float32)

    out_ref_, qk_ref_ = mha_reference(x, params, H)

    # Weight packing hoisted out of the forward (done once, reused below).
    packed_bf16 = pack_mha_params(params, H, compute_dtype=jnp.bfloat16)
    packed_f32 = pack_mha_params(params, H, compute_dtype=jnp.float32)

    # 1) Default perf config: bf16 MXU feed, bf16 softmax exp, no qk writeback.
    out, qk = mha_forward_packed(x, packed_bf16)
    out = jax.block_until_ready(out)
    assert qk is None
    assert out.shape == (B, T, D) and out.dtype == x.dtype
    assert jnp.allclose(out, out_ref_, atol=7e-2, rtol=7e-2)

    # 2) qk requested as f32 logits (module semantics), still bf16 MXU feed.
    out2, qk2 = mha_forward_packed(x, packed_bf16, return_qk=True,
                                   qk_dtype=jnp.float32)
    out2 = jax.block_until_ready(out2)
    qk2 = jax.block_until_ready(qk2)
    assert qk2.shape == (B, H, T, T) and qk2.dtype == jnp.float32
    assert jnp.allclose(out2, out_ref_, atol=7e-2, rtol=7e-2)
    assert jnp.allclose(qk2, qk_ref_, atol=7e-2, rtol=7e-2)

    # 3) f32-fed MXU path with f32 softmax (v5e-style config), tighter check.
    out3, qk3 = mha_forward_packed(x, packed_f32, return_qk=True,
                                   qk_dtype=jnp.float32,
                                   softmax_dtype=jnp.float32)
    out3 = jax.block_until_ready(out3)
    qk3 = jax.block_until_ready(qk3)
    assert jnp.allclose(out3, out_ref_, atol=3e-2, rtol=3e-2)
    assert jnp.allclose(qk3, qk_ref_, atol=3e-2, rtol=3e-2)

    print("KERNEL_OK")
</pallas_src>

<mosaic_0001>
module attributes {stable_mosaic.version = 11 : i64} {
  func.func @kernel(%arg0: i32, %arg1: i32, %arg2: i32, %arg3: memref<1x8x32xbf16, #tpu.memory_space<vmem>>, %arg4: memref<1x32x32xbf16, #tpu.memory_space<vmem>>, %arg5: memref<1x1x32xbf16, #tpu.memory_space<vmem>>, %arg6: memref<1x32x64xbf16, #tpu.memory_space<vmem>>, %arg7: memref<1x1x64xbf16, #tpu.memory_space<vmem>>, %arg8: memref<1x32x32xbf16, #tpu.memory_space<vmem>>, %arg9: memref<1x32xbf16, #tpu.memory_space<vmem>>, %arg10: memref<1x8x32xf32, #tpu.memory_space<vmem>>, %arg11: memref<8x32xf32, #tpu.memory_space<vmem>>, %arg12: memref<1x8x64xbf16, #tpu.memory_space<vmem>>) attributes {dimension_semantics = [#tpu.dimension_semantics<parallel>, #tpu.dimension_semantics<arbitrary>, #tpu.dimension_semantics<arbitrary>], iteration_bounds = array<i64: 2, 1, 1>, scalar_prefetch = 0 : i64, scratch_operands = 2 : i64, tpu.core_type = #tpu.core_type<tc>, window_params = [{transform_indices = @transform_0, window_bounds = array<i64: 1, 8, 32>}, {pipeline_mode = #tpu.pipeline_mode<synchronous>, transform_indices = @transform_1, window_bounds = array<i64: 1, 32, 32>}, {pipeline_mode = #tpu.pipeline_mode<synchronous>, transform_indices = @transform_2, window_bounds = array<i64: 1, 1, 32>}, {pipeline_mode = #tpu.pipeline_mode<synchronous>, transform_indices = @transform_3, window_bounds = array<i64: 1, 32, 64>}, {pipeline_mode = #tpu.pipeline_mode<synchronous>, transform_indices = @transform_4, window_bounds = array<i64: 1, 1, 64>}, {pipeline_mode = #tpu.pipeline_mode<synchronous>, transform_indices = @transform_5, window_bounds = array<i64: 1, 32, 32>}, {pipeline_mode = #tpu.pipeline_mode<synchronous>, transform_indices = @transform_6, window_bounds = array<i64: 1, 32>}, {transform_indices = @transform_7, window_bounds = array<i64: 1, 8, 32>}]} {
    %c0_i32 = arith.constant 0 : i32
    %0 = arith.cmpi eq, %arg1, %c0_i32 : i32
    %1 = arith.extui %0 : i1 to i32
    %c0_i32_0 = arith.constant 0 : i32
    %2 = arith.cmpi ne, %1, %c0_i32_0 : i32
    scf.if %2 {
      %c0_40 = arith.constant 0 : index
      %c0_41 = arith.constant 0 : index
      %c0_42 = arith.constant 0 : index
      %101 = vector.load %arg3[%c0_40, %c0_41, %c0_42] : memref<1x8x32xbf16, #tpu.memory_space<vmem>>, vector<1x8x32xbf16>
      %102 = vector.shape_cast %101 : vector<1x8x32xbf16> to vector<8x32xbf16>
      %c0_43 = arith.constant 0 : index
      %c0_44 = arith.constant 0 : index
      %c0_45 = arith.constant 0 : index
      %103 = vector.load %arg6[%c0_43, %c0_44, %c0_45] : memref<1x32x64xbf16, #tpu.memory_space<vmem>>, vector<1x32x64xbf16>
      %104 = vector.shape_cast %103 : vector<1x32x64xbf16> to vector<32x64xbf16>
      %cst_46 = arith.constant dense<0.000000e+00> : vector<8x64xf32>
      %105 = tpu.matmul %102, %104, %cst_46 {dimension_numbers = #tpu.dot_dimension_numbers<[1], [0], [0], [1], [0, 0, 1, 1], [], []>} : vector<8x32xbf16>, vector<32x64xbf16>, vector<8x64xf32> -> vector<8x64xf32>
      %c0_47 = arith.constant 0 : index
      %c0_48 = arith.constant 0 : index
      %c0_49 = arith.constant 0 : index
      %106 = vector.load %arg7[%c0_47, %c0_48, %c0_49] : memref<1x1x64xbf16, #tpu.memory_space<vmem>>, vector<1x1x64xbf16>
      %107 = vector.shape_cast %106 : vector<1x1x64xbf16> to vector<1x64xbf16>
      %108 = arith.extf %107 : vector<1x64xbf16> to vector<1x64xf32>
      %109 = vector.broadcast %108 : vector<1x64xf32> to vector<8x64xf32>
      %110 = arith.addf %105, %109 : vector<8x64xf32>
      %111 = arith.truncf %110 : vector<8x64xf32> to vector<8x64xbf16>
      %c0_50 = arith.constant 0 : index
      %c0_51 = arith.constant 0 : index
      %c0_52 = arith.constant 0 : index
      %112 = vector.load %arg12[%c0_50, %c0_51, %c0_52] : memref<1x8x64xbf16, #tpu.memory_space<vmem>>, vector<1x8x64xbf16>
      %113 = vector.shape_cast %112 : vector<1x8x64xbf16> to vector<8x64xbf16>
      %114 = vector.shape_cast %111 : vector<8x64xbf16> to vector<1x8x64xbf16>
      tpu.vector_store %arg12[%c0_50, %c0_51, %c0_52], %114 {strides = array<i32>} : memref<1x8x64xbf16, #tpu.memory_space<vmem>>, vector<1x8x64xbf16>,
    } else {
    }
    %c0 = arith.constant 0 : index
    %c0_1 = arith.constant 0 : index
    %c0_2 = arith.constant 0 : index
    %3 = vector.load %arg3[%c0, %c0_1, %c0_2] : memref<1x8x32xbf16, #tpu.memory_space<vmem>>, vector<1x8x32xbf16>
    %4 = vector.shape_cast %3 : vector<1x8x32xbf16> to vector<8x32xbf16>
    %c0_3 = arith.constant 0 : index
    %c0_4 = arith.constant 0 : index
    %c0_5 = arith.constant 0 : index
    %5 = vector.load %arg4[%c0_3, %c0_4, %c0_5] : memref<1x32x32xbf16, #tpu.memory_space<vmem>>, vector<1x32x32xbf16>
    %6 = vector.shape_cast %5 : vector<1x32x32xbf16> to vector<32x32xbf16>
    %cst = arith.constant dense<0.000000e+00> : vector<8x32xf32>
    %7 = tpu.matmul %4, %6, %cst {dimension_numbers = #tpu.dot_dimension_numbers<[1], [0], [0], [1], [0, 0, 1, 1], [], []>} : vector<8x32xbf16>, vector<32x32xbf16>, vector<8x32xf32> -> vector<8x32xf32>
    %c0_6 = arith.constant 0 : index
    %c0_7 = arith.constant 0 : index
    %c0_8 = arith.constant 0 : index
    %8 = vector.load %arg5[%c0_6, %c0_7, %c0_8] : memref<1x1x32xbf16, #tpu.memory_space<vmem>>, vector<1x1x32xbf16>
    %9 = vector.shape_cast %8 : vector<1x1x32xbf16> to vector<1x32xbf16>
    %10 = arith.extf %9 : vector<1x32xbf16> to vector<1x32xf32>
    %11 = vector.broadcast %10 : vector<1x32xf32> to vector<8x32xf32>
    %12 = arith.addf %7, %11 : vector<8x32xf32>
    %13 = arith.truncf %12 : vector<8x32xf32> to vector<8x32xbf16>
    %c0_9 = arith.constant 0 : index
    %c0_10 = arith.constant 0 : index
    %c0_11 = arith.constant 0 : index
    %14 = vector.load %arg12[%c0_9, %c0_10, %c0_11] : memref<1x8x64xbf16, #tpu.memory_space<vmem>>, vector<1x8x64xbf16>
    %15 = vector.shape_cast %14 : vector<1x8x64xbf16> to vector<8x64xbf16>
    %c0_i32_12 = arith.constant 0 : i32
    %16 = arith.cmpi eq, %arg2, %c0_i32_12 : i32
    %17 = arith.extui %16 : i1 to i32
    %c0_i32_13 = arith.constant 0 : i32
    %18 = arith.cmpi ne, %17, %c0_i32_13 : i32
    scf.if %18 {
      %cst_40 = arith.constant 0.000000e+00 : f32
      %101 = vector.broadcast %cst_40 : f32 to vector<8x32xf32>
      %c0_41 = arith.constant 0 : index
      %c0_42 = arith.constant 0 : index
      %102 = vector.load %arg11[%c0_41, %c0_42] : memref<8x32xf32, #tpu.memory_space<vmem>>, vector<8x32xf32>
      tpu.vector_store %arg11[%c0_41, %c0_42], %101 {strides = array<i32>} : memref<8x32xf32, #tpu.memory_space<vmem>>, vector<8x32xf32>,
    } else {
    }
    %19 = vector.extract_strided_slice %13 {offsets = [0, 0], sizes = [8, 8], strides = [1, 1]} : vector<8x32xbf16> to vector<8x8xbf16>
    %20 = vector.extract_strided_slice %15 {offsets = [0, 0], sizes = [8, 8], strides = [1, 1]} : vector<8x64xbf16> to vector<8x8xbf16>
    %21 = vector.extract_strided_slice %15 {offsets = [0, 32], sizes = [8, 8], strides = [1, 1]} : vector<8x64xbf16> to vector<8x8xbf16>
    %cst_14 = arith.constant dense<0.000000e+00> : vector<8x8xf32>
    %22 = tpu.matmul %19, %20, %cst_14 {dimension_numbers = #tpu.dot_dimension_numbers<[1], [1], [0], [0], [0, 0, 1, 0], [], []>} : vector<8x8xbf16>, vector<8x8xbf16>, vector<8x8xf32> -> vector<8x8xf32>
    %cst_15 = arith.constant dense<0xFF800000> : vector<8xf32>
    %23 = vector.multi_reduction <maximumf>, %22, %cst_15 [1] : vector<8x8xf32> to vector<8xf32>
    %24 = vector.shape_cast %23 : vector<8xf32> to vector<8x1xf32>
    %25 = vector.broadcast %24 : vector<8x1xf32> to vector<8x8xf32>
    %26 = arith.subf %22, %25 : vector<8x8xf32>
    %27 = arith.truncf %26 : vector<8x8xf32> to vector<8x8xbf16>
    %28 = math.exp %27 : vector<8x8xbf16>
    %29 = arith.extf %28 : vector<8x8xbf16> to vector<8x8xf32>
    %cst_16 = arith.constant dense<0.000000e+00> : vector<8xf32>
    %30 = vector.multi_reduction <add>, %29, %cst_16 [1] : vector<8x8xf32> to vector<8xf32>
    %31 = vector.shape_cast %30 : vector<8xf32> to vector<8x1xf32>
    %32 = tpu.reciprocal %31 {approx = true} : vector<8x1xf32> -> vector<8x1xf32>
    %cst_17 = arith.constant dense<0.000000e+00> : vector<8x8xf32>
    %33 = tpu.matmul %28, %21, %cst_17 {dimension_numbers = #tpu.dot_dimension_numbers<[1], [0], [0], [1], [0, 0, 1, 1], [], []>} : vector<8x8xbf16>, vector<8x8xbf16>, vector<8x8xf32> -> vector<8x8xf32>
    %34 = vector.broadcast %32 : vector<8x1xf32> to vector<8x8xf32>
    %35 = arith.mulf %33, %34 : vector<8x8xf32>
    %36 = arith.truncf %35 : vector<8x8xf32> to vector<8x8xbf16>
    %37 = vector.extract_strided_slice %13 {offsets = [0, 8], sizes = [8, 8], strides = [1, 1]} : vector<8x32xbf16> to vector<8x8xbf16>
    %38 = vector.extract_strided_slice %15 {offsets = [0, 8], sizes = [8, 8], strides = [1, 1]} : vector<8x64xbf16> to vector<8x8xbf16>
    %39 = vector.extract_strided_slice %15 {offsets = [0, 40], sizes = [8, 8], strides = [1, 1]} : vector<8x64xbf16> to vector<8x8xbf16>
    %cst_18 = arith.constant dense<0.000000e+00> : vector<8x8xf32>
    %40 = tpu.matmul %37, %38, %cst_18 {dimension_numbers = #tpu.dot_dimension_numbers<[1], [1], [0], [0], [0, 0, 1, 0], [], []>} : vector<8x8xbf16>, vector<8x8xbf16>, vector<8x8xf32> -> vector<8x8xf32>
    %cst_19 = arith.constant dense<0xFF800000> : vector<8xf32>
    %41 = vector.multi_reduction <maximumf>, %40, %cst_19 [1] : vector<8x8xf32> to vector<8xf32>
    %42 = vector.shape_cast %41 : vector<8xf32> to vector<8x1xf32>
    %43 = vector.broadcast %42 : vector<8x1xf32> to vector<8x8xf32>
    %44 = arith.subf %40, %43 : vector<8x8xf32>
    %45 = arith.truncf %44 : vector<8x8xf32> to vector<8x8xbf16>
    %46 = math.exp %45 : vector<8x8xbf16>
    %47 = arith.extf %46 : vector<8x8xbf16> to vector<8x8xf32>
    %cst_20 = arith.constant dense<0.000000e+00> : vector<8xf32>
    %48 = vector.multi_reduction <add>, %47, %cst_20 [1] : vector<8x8xf32> to vector<8xf32>
    %49 = vector.shape_cast %48 : vector<8xf32> to vector<8x1xf32>
    %50 = tpu.reciprocal %49 {approx = true} : vector<8x1xf32> -> vector<8x1xf32>
    %cst_21 = arith.constant dense<0.000000e+00> : vector<8x8xf32>
    %51 = tpu.matmul %46, %39, %cst_21 {dimension_numbers = #tpu.dot_dimension_numbers<[1], [0], [0], [1], [0, 0, 1, 1], [], []>} : vector<8x8xbf16>, vector<8x8xbf16>, vector<8x8xf32> -> vector<8x8xf32>
    %52 = vector.broadcast %50 : vector<8x1xf32> to vector<8x8xf32>
    %53 = arith.mulf %51, %52 : vector<8x8xf32>
    %54 = arith.truncf %53 : vector<8x8xf32> to vector<8x8xbf16>
    %55 = vector.extract_strided_slice %13 {offsets = [0, 16], sizes = [8, 8], strides = [1, 1]} : vector<8x32xbf16> to vector<8x8xbf16>
    %56 = vector.extract_strided_slice %15 {offsets = [0, 16], sizes = [8, 8], strides = [1, 1]} : vector<8x64xbf16> to vector<8x8xbf16>
    %57 = vector.extract_strided_slice %15 {offsets = [0, 48], sizes = [8, 8], strides = [1, 1]} : vector<8x64xbf16> to vector<8x8xbf16>
    %cst_22 = arith.constant dense<0.000000e+00> : vector<8x8xf32>
    %58 = tpu.matmul %55, %56, %cst_22 {dimension_numbers = #tpu.dot_dimension_numbers<[1], [1], [0], [0], [0, 0, 1, 0], [], []>} : vector<8x8xbf16>, vector<8x8xbf16>, vector<8x8xf32> -> vector<8x8xf32>
    %cst_23 = arith.constant dense<0xFF800000> : vector<8xf32>
    %59 = vector.multi_reduction <maximumf>, %58, %cst_23 [1] : vector<8x8xf32> to vector<8xf32>
    %60 = vector.shape_cast %59 : vector<8xf32> to vector<8x1xf32>
    %61 = vector.broadcast %60 : vector<8x1xf32> to vector<8x8xf32>
    %62 = arith.subf %58, %61 : vector<8x8xf32>
    %63 = arith.truncf %62 : vector<8x8xf32> to vector<8x8xbf16>
    %64 = math.exp %63 : vector<8x8xbf16>
    %65 = arith.extf %64 : vector<8x8xbf16> to vector<8x8xf32>
    %cst_24 = arith.constant dense<0.000000e+00> : vector<8xf32>
    %66 = vector.multi_reduction <add>, %65, %cst_24 [1] : vector<8x8xf32> to vector<8xf32>
    %67 = vector.shape_cast %66 : vector<8xf32> to vector<8x1xf32>
    %68 = tpu.reciprocal %67 {approx = true} : vector<8x1xf32> -> vector<8x1xf32>
    %cst_25 = arith.constant dense<0.000000e+00> : vector<8x8xf32>
    %69 = tpu.matmul %64, %57, %cst_25 {dimension_numbers = #tpu.dot_dimension_numbers<[1], [0], [0], [1], [0, 0, 1, 1], [], []>} : vector<8x8xbf16>, vector<8x8xbf16>, vector<8x8xf32> -> vector<8x8xf32>
    %70 = vector.broadcast %68 : vector<8x1xf32> to vector<8x8xf32>
    %71 = arith.mulf %69, %70 : vector<8x8xf32>
    %72 = arith.truncf %71 : vector<8x8xf32> to vector<8x8xbf16>
    %73 = vector.extract_strided_slice %13 {offsets = [0, 24], sizes = [8, 8], strides = [1, 1]} : vector<8x32xbf16> to vector<8x8xbf16>
    %74 = vector.extract_strided_slice %15 {offsets = [0, 24], sizes = [8, 8], strides = [1, 1]} : vector<8x64xbf16> to vector<8x8xbf16>
    %75 = vector.extract_strided_slice %15 {offsets = [0, 56], sizes = [8, 8], strides = [1, 1]} : vector<8x64xbf16> to vector<8x8xbf16>
    %cst_26 = arith.constant dense<0.000000e+00> : vector<8x8xf32>
    %76 = tpu.matmul %73, %74, %cst_26 {dimension_numbers = #tpu.dot_dimension_numbers<[1], [1], [0], [0], [0, 0, 1, 0], [], []>} : vector<8x8xbf16>, vector<8x8xbf16>, vector<8x8xf32> -> vector<8x8xf32>
    %cst_27 = arith.constant dense<0xFF800000> : vector<8xf32>
    %77 = vector.multi_reduction <maximumf>, %76, %cst_27 [1] : vector<8x8xf32> to vector<8xf32>
    %78 = vector.shape_cast %77 : vector<8xf32> to vector<8x1xf32>
    %79 = vector.broadcast %78 : vector<8x1xf32> to vector<8x8xf32>
    %80 = arith.subf %76, %79 : vector<8x8xf32>
    %81 = arith.truncf %80 : vector<8x8xf32> to vector<8x8xbf16>
    %82 = math.exp %81 : vector<8x8xbf16>
    %83 = arith.extf %82 : vector<8x8xbf16> to vector<8x8xf32>
    %cst_28 = arith.constant dense<0.000000e+00> : vector<8xf32>
    %84 = vector.multi_reduction <add>, %83, %cst_28 [1] : vector<8x8xf32> to vector<8xf32>
    %85 = vector.shape_cast %84 : vector<8xf32> to vector<8x1xf32>
    %86 = tpu.reciprocal %85 {approx = true} : vector<8x1xf32> -> vector<8x1xf32>
    %cst_29 = arith.constant dense<0.000000e+00> : vector<8x8xf32>
    %87 = tpu.matmul %82, %75, %cst_29 {dimension_numbers = #tpu.dot_dimension_numbers<[1], [0], [0], [1], [0, 0, 1, 1], [], []>} : vector<8x8xbf16>, vector<8x8xbf16>, vector<8x8xf32> -> vector<8x8xf32>
    %88 = vector.broadcast %86 : vector<8x1xf32> to vector<8x8xf32>
    %89 = arith.mulf %87, %88 : vector<8x8xf32>
    %90 = arith.truncf %89 : vector<8x8xf32> to vector<8x8xbf16>
    %91 = tpu.concatenate %36, %54, %72, %90 in 1 : vector<8x8xbf16>, vector<8x8xbf16>, vector<8x8xbf16>, vector<8x8xbf16> -> vector<8x32xbf16>
    %c0_30 = arith.constant 0 : index
    %c0_31 = arith.constant 0 : index
    %92 = vector.load %arg11[%c0_30, %c0_31] : memref<8x32xf32, #tpu.memory_space<vmem>>, vector<8x32xf32>
    %c0_32 = arith.constant 0 : index
    %c0_33 = arith.constant 0 : index
    %c0_34 = arith.constant 0 : index
    %93 = vector.load %arg8[%c0_32, %c0_33, %c0_34] : memref<1x32x32xbf16, #tpu.memory_space<vmem>>, vector<1x32x32xbf16>
    %94 = vector.shape_cast %93 : vector<1x32x32xbf16> to vector<32x32xbf16>
    %cst_35 = arith.constant dense<0.000000e+00> : vector<8x32xf32>
    %95 = tpu.matmul %91, %94, %cst_35 {dimension_numbers = #tpu.dot_dimension_numbers<[1], [0], [0], [1], [0, 0, 1, 1], [], []>} : vector<8x32xbf16>, vector<32x32xbf16>, vector<8x32xf32> -> vector<8x32xf32>
    %96 = arith.addf %92, %95 : vector<8x32xf32>
    %c0_36 = arith.constant 0 : index
    %c0_37 = arith.constant 0 : index
    %97 = vector.load %arg11[%c0_36, %c0_37] : memref<8x32xf32, #tpu.memory_space<vmem>>, vector<8x32xf32>
    tpu.vector_store %arg11[%c0_36, %c0_37], %96 {strides = array<i32>} : memref<8x32xf32, #tpu.memory_space<vmem>>, vector<8x32xf32>,
    %c0_i32_38 = arith.constant 0 : i32
    %98 = arith.cmpi eq, %arg2, %c0_i32_38 : i32
    %99 = arith.extui %98 : i1 to i32
    %c0_i32_39 = arith.constant 0 : i32
    %100 = arith.cmpi ne, %99, %c0_i32_39 : i32
    scf.if %100 {
      %c0_40 = arith.constant 0 : index
      %c0_41 = arith.constant 0 : index
      %101 = vector.load %arg11[%c0_40, %c0_41] : memref<8x32xf32, #tpu.memory_space<vmem>>, vector<8x32xf32>
      %c0_42 = arith.constant 0 : index
      %c0_43 = arith.constant 0 : index
      %102 = vector.load %arg9[%c0_42, %c0_43] : memref<1x32xbf16, #tpu.memory_space<vmem>>, vector<1x32xbf16>
      %103 = arith.extf %102 : vector<1x32xbf16> to vector<1x32xf32>
      %104 = vector.broadcast %103 : vector<1x32xf32> to vector<8x32xf32>
      %105 = arith.addf %101, %104 : vector<8x32xf32>
      %c0_44 = arith.constant 0 : index
      %c0_45 = arith.constant 0 : index
      %c0_46 = arith.constant 0 : index
      %106 = vector.load %arg10[%c0_44, %c0_45, %c0_46] : memref<1x8x32xf32, #tpu.memory_space<vmem>>, vector<1x8x32xf32>
      %107 = vector.shape_cast %106 : vector<1x8x32xf32> to vector<8x32xf32>
      %108 = vector.shape_cast %105 : vector<8x32xf32> to vector<1x8x32xf32>
      tpu.vector_store %arg10[%c0_44, %c0_45, %c0_46], %108 {strides = array<i32>} : memref<1x8x32xf32, #tpu.memory_space<vmem>>, vector<1x8x32xf32>,
    } else {
    }
    return
  }
  func.func @transform_0(%arg0: i32, %arg1: i32, %arg2: i32) -> (i32, i32, i32) {
    %c0_i32 = arith.constant 0 : i32
    %c0_i32_0 = arith.constant 0 : i32
    %c0_i32_1 = arith.constant 0 : i32
    return %arg0, %c0_i32, %c0_i32_0 : i32, i32, i32
  }
  func.func @transform_1(%arg0: i32, %arg1: i32, %arg2: i32) -> (i32, i32, i32) {
    %c0_i32 = arith.constant 0 : i32
    %c0_i32_0 = arith.constant 0 : i32
    %c0_i32_1 = arith.constant 0 : i32
    %c0_i32_2 = arith.constant 0 : i32
    return %c0_i32, %c0_i32_0, %c0_i32_1 : i32, i32, i32
  }
  func.func @transform_2(%arg0: i32, %arg1: i32, %arg2: i32) -> (i32, i32, i32) {
    %c0_i32 = arith.constant 0 : i32
    %c0_i32_0 = arith.constant 0 : i32
    %c0_i32_1 = arith.constant 0 : i32
    %c0_i32_2 = arith.constant 0 : i32
    return %c0_i32, %c0_i32_0, %c0_i32_1 : i32, i32, i32
  }
  func.func @transform_3(%arg0: i32, %arg1: i32, %arg2: i32) -> (i32, i32, i32) {
    %c0_i32 = arith.constant 0 : i32
    %c0_i32_0 = arith.constant 0 : i32
    %c0_i32_1 = arith.constant 0 : i32
    %c0_i32_2 = arith.constant 0 : i32
    return %c0_i32, %c0_i32_0, %c0_i32_1 : i32, i32, i32
  }
  func.func @transform_4(%arg0: i32, %arg1: i32, %arg2: i32) -> (i32, i32, i32) {
    %c0_i32 = arith.constant 0 : i32
    %c0_i32_0 = arith.constant 0 : i32
    %c0_i32_1 = arith.constant 0 : i32
    %c0_i32_2 = arith.constant 0 : i32
    return %c0_i32, %c0_i32_0, %c0_i32_1 : i32, i32, i32
  }
  func.func @transform_5(%arg0: i32, %arg1: i32, %arg2: i32) -> (i32, i32, i32) {
    %c0_i32 = arith.constant 0 : i32
    %c0_i32_0 = arith.constant 0 : i32
    %c0_i32_1 = arith.constant 0 : i32
    %c0_i32_2 = arith.constant 0 : i32
    return %c0_i32, %c0_i32_0, %c0_i32_1 : i32, i32, i32
  }
  func.func @transform_6(%arg0: i32, %arg1: i32, %arg2: i32) -> (i32, i32) {
    %c0_i32 = arith.constant 0 : i32
    %c0_i32_0 = arith.constant 0 : i32
    %c0_i32_1 = arith.constant 0 : i32
    return %c0_i32, %c0_i32_0 : i32, i32
  }
  func.func @transform_7(%arg0: i32, %arg1: i32, %arg2: i32) -> (i32, i32, i32) {
    %c0_i32 = arith.constant 0 : i32
    %c0_i32_0 = arith.constant 0 : i32
    return %arg0, %arg1, %c0_i32 : i32, i32, i32
  }
}

</mosaic_0001>

<bundles_post_ra>
// kernel: tpu_custom_call.1
= control target key start
LH: loop header
LB: loop body
LE: loop exit
PB: predicated region body
PF: predicated region fallthrough
CT: control target
= control target key end

     0   :  { %12 = vsyncpa [#allocation5], 0  ;;  %s1986_s0 = inlined_call_operand.hbm [shape: bf16[2,8,32], index: 0, kind: input, shape index: {}]   ;;  %s1987_s1 = inlined_call_operand.hbm [shape: bf16[1,32,32], index: 1, kind: input, shape index: {}]   ;;  %s1988_s2 = inlined_call_operand.vmem [shape: bf16[1,1,32], index: 2, kind: input, shape index: {}]   ;;  %s1989_s3 = inlined_call_operand.hbm [shape: bf16[1,32,64], index: 3, kind: input, shape index: {}]   ;;  %s1990_s4 = inlined_call_operand.vmem [shape: bf16[1,1,64], index: 4, kind: input, shape index: {}]   ;;  %s1991_s5 = inlined_call_operand.vmem [shape: bf16[1,32,32], index: 5, kind: input, shape index: {}]   ;;  %s1992_s6 = inlined_call_operand.vmem [shape: bf16[1,32], index: 6, kind: input, shape index: {}]   ;;  %s1993_s7 = inlined_call_operand.hbm [shape: f32[2,8,32], index: 7, kind: output, shape index: {}]  }
   0x1   :  { %14 = vsyncpa [#allocation5 + $0x1], 0 }
   0x2   :  { %15 = vsyncpa [#allocation8], 0 }
   0x3   :  { %16 = vsyncpa [#allocation6], 0 }
   0x4   :  { %18 = vsyncpa [#allocation6 + $0x1], 0  ;;  %s1638_s24 = smov 0   ;;  %s1640_s25 = smov 0  }
   0x5   :  { %s1642_s26 = smov 0   ;;  %s1644_s27 = smov 0  }
   0x6   :  { %s1646_s28 = smov 0   ;;  %s1648_s29 = smov 0  }
   0x7 LB: > { %2000 = sst [smem:[#allocation14_spill]] %s1558_s24  ;;  %s1154_s30 = sadd.s32 4294967295, %s1578_s29   ;;  %s1578_s29 = sphi %s1648_s29, %s24_s29   ;;  %s1574_s28 = sphi %s1646_s28, %s2021_s28   ;;  %s1570_s27 = sphi %s1644_s27, %s2020_s27   ;;  %s1566_s26 = sphi %s1642_s26, %s2019_s26   ;;  %s1562_s25 = sphi %s1640_s25, %s2018_s25   ;;  %s1558_s24 = sphi %s1638_s24, %s2017_s24  }
   0x8   : > { %s1155_s8 = sadd.s32 4294967294, %s1578_s29   ;;  %p63_p0 = scmp.ne.s32.totalorder %s1562_s25, %s1558_s24 }
   0x9   : > { %p1672_p1 = scmp.eq.s32.totalorder %s1154_s30, 0  ;;  %p1676_p2 = scmp.eq.s32.totalorder %s1154_s30, 1 }
   0xa   : > { %p221_p3 = scmp.eq.s32.totalorder %s1155_s8, 1  ;;  %p1156_p5 = scmp.ge.s32.totalorder %s1578_s29, 1 }
   0xb   : > { %s2001_s9 = scalar_select %p1672_p1, 1, 0 }
   0xc   : > { %p1682_p4 = por %p1672_p1, %p63_p0  ;;  %p1687_p6 = por %p221_p3, %p63_p0 }
   0xd   : > { %p228_p7 = scmp.lt.s32.totalorder %s1578_s29, 3  ;;  %s1580_s14 = smov [#allocation7]  }
   0xe   : > { %s2003_s11 = scalar_select %p1682_p4, 1, 0 }
   0xf   : > { %s2004_s12 = scalar_select %p1687_p6, 1, 0 }
  0x10   : > { %p1692_p8 = pnand %p1156_p5, %p228_p7  ;;  %s240_s15 = sshll.u32 %s1580_s14, 4  ;;  %s1696_s15 = int_to_ptr.vmem [resolvable:$true] %s240_s15 }
  0x11   : > { %2005 = sst [smem:[#allocation15_spill]] %s2004_s12  ;;  %s1581_s17 = smov [#allocation9]  }
  0x12   : > { %p1298_p9 = pneg %p1692_p8  ;;  %s256_s18 = sshll.u32 %s1581_s17, 4  ;;  %s1707_s18 = int_to_ptr.vmem [resolvable:$true] %s256_s18 }
  0x13   : > { %s1406_s21 = scalar_lea.hbm %s1987_s1, 256 }
  0x14   : > { %p1703_p11 = pnand %p1298_p9, %p1672_p1  ;;  %p1407_p12 = scmp.ne.s32.totalorder %s1987_s1, %s1406_s21 }
  0x15   : > { %p1413_p5 = scmp.lt.u32.totalorder %s1406_s21, %s1987_s1 }
  0x16   : > { %p1408_p13 = pneg %p1703_p11 }
  0x18   : > { %p1409_p0 = pnand %p1408_p13, %p1407_p12 }
  0x1a   : > { %p1410_p3 = pneg %p1409_p0 }
  0x1c   : > { %p1415_p7 = pnand %p1413_p5, %p1410_p3 }
  0x1e   : > { %1418 = shalt.err (!%p1415_p7)
}
  0x1f   : > { %s1419_s14 = scalar_lea.vmem %s1696_s15, 256  ;;  %p1427_p1 = scmp.lt.s32.totalorder %s1696_s15, %s1696_s15 }
  0x20   : > { %p1420_p9 = scmp.ne.s32.totalorder %s1696_s15, %s1419_s14  ;;  %p1428_p12 = scmp.lt.s32.totalorder %s1419_s14, %s1419_s14 }
  0x22   : > { %p1422_p10 = pnand %p1420_p9, %p1408_p13  ;;  %p1429_p0 = por %p1428_p12, %p1427_p1 }
  0x24   : > { %p1423_p6 = pneg %p1422_p10 }
  0x26   : > { %p1430_p4 = pnand %p1429_p0, %p1423_p6 }
  0x28   : > { %1433 = shalt.err (!%p1430_p4)
}
  0x29   : > { %s1582_s17 = smov 64   ;;  %s1583_s19 = smov 4  }
  0x2a   : > { %1301 = dma.hbm_to_vmem [thread:$0]  (!%p1703_p11), %s1987_s1, 256, %s1696_s15, [#allocation8], %s1582_s17, %s1582_s17, %s1583_s19  }
  0x2b   : > { %s1434_s30 = scalar_lea.hbm %s1989_s3, 256 }
  0x2c   : > { %p1435_p1 = scmp.ne.s32.totalorder %s1989_s3, %s1434_s30  ;;  %p1441_p10 = scmp.lt.u32.totalorder %s1434_s30, %s1989_s3 }
  0x2e   : > { %p1437_p4 = pnand %p1435_p1, %p1408_p13 }
  0x30   : > { %p1438_p6 = pneg %p1437_p4 }
  0x32   : > { %p1443_p3 = pnand %p1441_p10, %p1438_p6 }
  0x34   : > { %1446 = shalt.err (!%p1443_p3)
}
  0x35   : > { %s1447_s15 = scalar_lea.vmem %s1707_s18, 256  ;;  %p1455_p12 = scmp.lt.s32.totalorder %s1707_s18, %s1707_s18 }
  0x36   : > { %p1448_p5 = scmp.ne.s32.totalorder %s1707_s18, %s1447_s15  ;;  %p1456_p0 = scmp.lt.s32.totalorder %s1447_s15, %s1447_s15 }
  0x38   : > { %p1450_p7 = pnand %p1448_p5, %p1408_p13  ;;  %p1457_p1 = por %p1456_p0, %p1455_p12 }
  0x3a   : > { %p1451_p9 = pneg %p1450_p7 }
  0x3c   : > { %p1458_p4 = pnand %p1457_p1, %p1451_p9 }
  0x3e   : > { %1461 = shalt.err (!%p1458_p4)
}
  0x3f   : > { %1304 = dma.hbm_to_vmem [thread:$0]  (!%p1703_p11), %s1989_s3, 256, %s1707_s18, [#allocation8], %s1582_s17, %s1582_s17, %s1583_s19  }
  0x40   : > { %s43_s20 = sadd.s32 1, %s1574_s28  ;;  %s50_s21 = sadd.s32 1, %s1566_s26 }
  0x41   : > { %p45_p13 = scmp.ge.s32.totalorder %s43_s20, 2  ;;  %p57_p6 = scmp.ne.s32.totalorder %s1566_s26, %s1562_s25 }
  0x42   : > { %p58_p10 = scmp.eq.s32.totalorder %s1578_s29, 0  ;;  %p1315_p3 = scmp.lt.s32.totalorder %s1578_s29, 2 }
  0x43   : > { %s2023_s20 = smov (%p45_p13, %s43_s20), 0  ;;  %p1771_p7 = por %p1676_p2, %p57_p6 }
  0x44   : > { %p59_p5 = por %p58_p10, %p57_p6  ;;  %s47_s22 = ssub.s32 %s1574_s28, %s2023_s20 }
  0x45   : > { %s2008_s16 = scalar_select %p1771_p7, 1, 0 }
  0x46   : > { %s279_s23 = sand.u32 1, %s1566_s26   ;;  %p48_p9 = scmp.eq.s32.totalorder %s47_s22, 0 }
  0x47   : > { %s1160_s18 = sshll.u32 %s279_s23, 2  ;;  %s1161_s17 = sshll.u32 %s1574_s28, 6 }
  0x48   : > { %s1780_s19 = scalar_select %p48_p9, %s1566_s26, %s50_s21  }
  0x49   : > { %s1785_s14 = scalar_lea.hbm %s1986_s0, %s1161_s17  ;;  %s283_s10 = scalar_lea.vmem [#allocation4], %s1160_s18 }
  0x4a   : > { %s290_s15 = sshll.u32 %s283_s10, 4  ;;  %p1789_p2 = pnand %p1315_p3, %p59_p5  ;;  %s1793_s15 = int_to_ptr.vmem [resolvable:$true] %s290_s15 }
  0x4b   : > { %s280_s12 = scalar_lea.sflag [#allocation5], %s279_s23  ;;  %s1462_s21 = scalar_lea.hbm %s1785_s14, 64 }
  0x4c   : > { %p1463_p11 = scmp.ne.s32.totalorder %s1785_s14, %s1462_s21  ;;  %p1464_p12 = pneg %p1789_p2 }
  0x4d   : > { %s1467_s17 = scalar_lea.hbm %s1986_s0, 128  ;;  %p1468_p4 = scmp.lt.u32.totalorder %s1785_s14, %s1986_s0 }
  0x4e   : > { %p1465_p0 = pnand %p1464_p12, %p1463_p11  ;;  %p1469_p13 = scmp.lt.u32.totalorder %s1467_s17, %s1462_s21 }
  0x4f   : > { %p1471_p10 = scmp.lt.u32.totalorder %s1462_s21, %s1785_s14 }
  0x50   : > { %p1466_p1 = pneg %p1465_p0  ;;  %p1470_p6 = por %p1469_p13, %p1468_p4 }
  0x52   : > { %p1472_p3 = por %p1471_p10, %p1470_p6 }
  0x54   : > { %p1473_p5 = pnand %p1472_p3, %p1466_p1 }
  0x56   : > { %1476 = shalt.err (!%p1473_p5)
}
  0x57   : > { %s1477_s23 = scalar_lea.vmem %s1793_s15, 64  ;;  %s1584_s10 = smov [#allocation4]  }
  0x58   : > { %p1478_p9 = scmp.ne.s32.totalorder %s1793_s15, %s1477_s23  ;;  %s1482_s22 = sshll.u32 %s1584_s10, 4  ;;  %s1483_s22 = int_to_ptr.vmem [resolvable:$false] %s1482_s22 }
  0x59   : > { %s1484_s18 = scalar_lea.vmem %s1483_s22, 128  ;;  %p1485_p7 = scmp.lt.s32.totalorder %s1793_s15, %s1483_s22 }
  0x5a   : > { %p1480_p11 = pnand %p1478_p9, %p1464_p12  ;;  %p1486_p4 = scmp.lt.s32.totalorder %s1484_s18, %s1477_s23 }
  0x5c   : > { %p1481_p0 = pneg %p1480_p11  ;;  %p1487_p13 = por %p1486_p4, %p1485_p7 }
  0x5e   : > { %p1488_p6 = pnand %p1487_p13, %p1481_p0 }
  0x60   : > { %1491 = shalt.err (!%p1488_p6)
}
  0x61   : > { %1308 = dma.hbm_to_vmem [thread:$0]  (!%p1789_p2), %s1785_s14, 64, %s1793_s15, %s280_s12  }
  0x62   : > { %299 = sbr.rel (%p1692_p8) target bundleno = 1433 (0x599), region = 48  ;;  %s1823_s21 = sand.u32 (!%p1692_p8), 1, %s1562_s25  }
  0x63   : > { %s1163_s17 = sshll.u32 (!%p1692_p8), %s1823_s21, 2  ;;  %s302_s30 = scalar_lea.sflag (!%p1692_p8), [#allocation5], %s1823_s21 }
  0x64   : > { %s305_s8 = scalar_lea.vmem (!%p1692_p8), [#allocation4], %s1163_s17  ;;  %p2010_p7 = scmp.ne.s32.totalorder (!%p1692_p8), %s2003_s11, 0 }
  0x69   : > { %1545 = dma.done.wait (%p2010_p7), %s302_s30, 64  }
  0x6a   : > { %1547 = vsyncadd (%p2010_p7), %s302_s30, 4294967232  ;;  %p2011_p12 = scmp.ne.s32.totalorder %s2001_s9, 0 }
  0x6c   : > { %1549 = dma.done.wait (%p2011_p12), [#allocation8], 512  }
  0x6d   : > { %1551 = vsyncadd (%p2011_p12), [#allocation8], 4294966784  ;;  %vm372_vm0 = vcmask 261120   ;;  %v1585_v0 = vmov 0.0   ;;  %vm1586_vm1 = vmmov 0   ;;  %v1383_v1 = vld [vmem:[#allocation9] sm:$0xff]   ;;  %v356_v7 = vlaneseq }
  0x6e   : > { %1214 = vmatprep.subr.bf16.mxu0 %v1585_v0  ;;  %1218 = vmatprep.mubr.msk.bf16.mxu0 %vm1586_vm1, %v1585_v0  ;;  %492 = vst.msk [vmem:[#allocation2] sm:$0xff] %vm372_vm0, %v1585_v0  ;;  %v1384_v2 = vld [vmem:[#allocation9 + $0x8] sm:$0xff]   ;;  %v1385_v3 = vld [vmem:[#allocation7] sm:$0xff]   ;;  %v1386_v4 = vld [vmem:[#allocation7 + $0x8] sm:$0xff]   ;;  %vm417_vm2 = vcmask 519168   ;;  %vm493_vm3 = vcmask 64512  }
  0x6f   : > { %1222 = vmatprep.subr.bf16.mxu1 %v1585_v0  ;;  %1226 = vmatprep.mubr.msk.bf16.mxu1 %vm1586_vm1, %v1585_v0  ;;  %v349_v5 = vld [vmem:[%s305_s8] sm:$0xf]  ;;  %v357_v8 = vshrl.u32 %v356_v7, 7  ;;  %s1587_s15 = smov 112   ;;  %s1588_s24 = smov 120   ;;  %vm561_vm4 = vcmask 1043456  }
  0x70   : > { %1215 = vmatpush3.bf16.msra.mxu0 %v1383_v1  ;;  %1223 = vmatpush3.bf16.msra.mxu1 %v1385_v3  ;;  %v419_v6 = vld [vmem:[%s305_s8] sm:$0xf]  ;;  %s1589_s12 = smov 104   ;;  %s1590_s23 = smov 96   ;;  %vm959_vm5 = vcmask 130048   ;;  %vm962_vm6 = vcmask 195584  }
  0x71   : > { %1216 = vmatprep.subr.bf16.mxu0 %v1585_v0  ;;  %1224 = vmatprep.subr.bf16.mxu1 %v1585_v0  ;;  %v354_v9 = vld [vmem:[%s1990_s4] sm:$0x1]  ;;  %v1856_v11 = vsub.s32 0, %v357_v8  ;;  %s1591_s10 = smov 80   ;;  %s1592_s22 = smov 72  }
  0x72   : > { %v355_v10 = vunpack.c.l.bf16 %v354_v9  ;;  %v424_v14 = vld [vmem:[%s1988_s2] sm:$0x1]  ;;  %s1593_s18 = smov 88   ;;  %s1594_s11 = smov 8  }
  0x73   : > { %v425_v20 = vunpack.c.l.bf16 %v424_v14  ;;  %s1595_s13 = smov 16   ;;  %s1596_s14 = smov 24  }
  0x74   : > { %1217 = vmatpush3.bf16.msra.mxu0 %v1384_v2  ;;  %1225 = vmatpush3.bf16.msra.mxu1 %v1386_v4  ;;  %v359_v12 = vrot.slane %v355_v10, %v1856_v11  ;;  %s1039_s8 = scalar_lea.sflag [#allocation6], %s1823_s21  ;;  %p2012_p2 = scmp.ne.s32.totalorder %s2008_s16, 0 }
  0x75   : > { %1230 = vmatprep.subr.bf16.mxu0 %v1585_v0  ;;  %1236 = vmatprep.subr.bf16.mxu1 %v1585_v0  ;;  %v429_v25 = vrot.slane %v425_v20, %v1856_v11 }
  0x77   : > { %1219 = vmatmul.mubr.msk.bf16.vlgmr.msra.gmra.mrb[0].mxu0 %vm372_vm0, %v349_v5  ;;  %1227 = vmatmul.mubr.msk.bf16.vlgmr.msra.gmra.mrb[0].mxu1 %vm372_vm0, %v419_v6 }
  0x78   : > { %1232 = vmatprep.mubr.msk.bf16.mxu0 %vm1586_vm1, %v1585_v0  ;;  %1238 = vmatprep.mubr.msk.bf16.mxu1 %vm1586_vm1, %v1585_v0 }
 0x14a   : > { %v410_v13 = vpop.f32.mrb[0].mxu0  ;;  %v480_v21 = vpop.f32.mrb[0].mxu1 }
 0x14b   : > { %v411_v15 = vadd.f32 %v410_v13, %v359_v12  ;;  %v1220_v16 = vpop.f32.mrb[1].mxu0  ;;  %v1228_v22 = vpop.f32.mrb[1].mxu1  ;;  %v481_v26 = vadd.f32 %v480_v21, %v429_v25 }
 0x14c   : > { %v413_v17 = vpop.f32.mrb[2].mxu0  ;;  %v483_v23 = vpop.f32.mrb[2].mxu1 }
 0x14d   : > { %v416_v18 = vpack.c.bf16 %v411_v15, %v411_v15  ;;  %v1221_v19 = vpop.f32.mrb[3].mxu0  ;;  %v1229_v24 = vpop.f32.mrb[3].mxu1  ;;  %v486_v30 = vpack.c.bf16 %v481_v26, %v481_v26 }
 0x14f   : > { %418 = vst.msk [vmem:[#allocation3] sm:$0xf] %vm417_vm2, %v416_v18 }
 0x156   : > { %v487_v27 = vld [vmem:[#allocation3] sm:$0xf] }
 0x157   : > { %v498_v28 = vsel %vm493_vm3, %v487_v27, 0  ;;  %v1864_v29 = vcombine.low %v487_v27, %v487_v27 }
 0x158   : > { %1231 = vmatpush3.bf16.xpose.msra.mxu0 %v498_v28 }
 0x159   : > { %723 = vrot.lane.b32.xlu1 %v1864_v29, %s1587_s15  ;;  %610 = vrot.lane.b32.xlu0 %v1864_v29, %s1588_s24 }
 0x15a   : > { %1242 = vmatprep.subr.bf16.mxu0 %v1585_v0 }
 0x15d   : > { %721 = vrot.lane.b32.xlu1 %v486_v30, %s1587_s15  ;;  %608 = vrot.lane.b32.xlu0 %v486_v30, %s1588_s24 }
 0x15f   : > { %1233 = vmatmul.mubr.msk.bf16.vlgmr.msra.gmra.mrb[4].mxu0 %vm493_vm3, %v486_v30 }
 0x160   : > { %1244 = vmatprep.mubr.msk.bf16.mxu0 %vm1586_vm1, %v1585_v0 }
 0x161   : > { %834 = vrot.lane.b32.xlu1 %v486_v30, %s1589_s12  ;;  %836 = vrot.lane.b32.xlu0 %v1864_v29, %s1589_s12  ;;  %s1166_s12 = sshll.u32 %s1823_s21, 3 }
 0x165   : > { %556 = vrot.lane.b32.xlu1 %v1864_v29, %s1590_s23  ;;  %s1186_s23 = sshll.u32 %s1570_s27, 7  ;;  %s1597_s27 = smov [#allocation10]  }
 0x166   : > { %s1936_s30 = scalar_lea.hbm %s1993_s7, %s1186_s23 }
 0x1cb   : > { %v724_v31 = vpop.permute.xlu1 %723  ;;  %v611_v32 = vpop.permute.xlu0 %610 }
 0x1cc   : > { %v616_v33 = vsel %vm493_vm3, %v611_v32, 0  ;;  %v729_v37 = vsel %vm493_vm3, %v724_v31, 0 }
 0x1cd   : > { %1243 = vmatpush3.bf16.xpose.msra.mxu0 %v616_v33 }
 0x1ce   : > { %1254 = vmatprep.subr.bf16.mxu0 %v1585_v0 }
 0x1cf   : > { %v722_v34 = vpop.permute.xlu1 %721  ;;  %v609_v35 = vpop.permute.xlu0 %608 }
 0x1d3   : > { %v835_v36 = vpop.permute.xlu1 %834  ;;  %v837_v40 = vpop.permute.xlu0 %836 }
 0x1d4   : > { %1245 = vmatmul.mubr.msk.bf16.vlgmr.msra.gmra.mrb[8].mxu0 %vm493_vm3, %v609_v35  ;;  %v842_v41 = vsel %vm493_vm3, %v837_v40, 0 }
 0x1d5   : > { %1255 = vmatpush3.bf16.xpose.msra.mxu0 %v729_v37  ;;  %1256 = vmatprep.mubr.msk.bf16.mxu0 %vm1586_vm1, %v1585_v0 }
 0x1d6   : > { %1266 = vmatprep.subr.bf16.mxu0 %v1585_v0 }
 0x1d7   : > { %v557_v38 = vpop.permute.xlu1 %556 }
 0x1d8   : > { %v563_v39 = vsel %vm561_vm4, %v557_v38, 0 }
 0x1d9   : > { %1237 = vmatpush3.bf16.msra.mxu1 %v563_v39 }
 0x1da   : > { %1248 = vmatprep.subr.bf16.mxu1 %v1585_v0 }
 0x1dc   : > { %1257 = vmatmul.mubr.msk.bf16.vlgmr.msra.gmra.mrb[12].mxu0 %vm493_vm3, %v722_v34 }
 0x1dd   : > { %1267 = vmatpush3.bf16.xpose.msra.mxu0 %v842_v41  ;;  %1268 = vmatprep.mubr.msk.bf16.mxu0 %vm1586_vm1, %v1585_v0 }
 0x1de   : > { %1278 = vmatprep.subr.bf16.mxu0 %v1585_v0 }
 0x1e4   : > { %1269 = vmatmul.mubr.msk.bf16.vlgmr.msra.gmra.mrb[16].mxu0 %vm493_vm3, %v835_v36 }
 0x1e5   : > { %1282 = vmatprep.mubr.msk.bf16.mxu0 %vm1586_vm1, %v1585_v0 }
 0x232   : > { %v534_v42 = vpop.f32.mrb[4].mxu0 }
 0x233   : > { %v1234_v43 = vpop.f32.mrb[5].mxu0  ;;  %v540_v44 = vsel %vm493_vm3, %v534_v42, -inf }
 0x234   : > { %541 = vmax.xlane.f32.xlu0 %v540_v44  ;;  %v537_v45 = vpop.f32.mrb[6].mxu0 }
 0x235   : > { %v1235_v46 = vpop.f32.mrb[7].mxu0 }
 0x236   : > { %v1389_v46 = vld [vmem:[%s1991_s5 + $0x8] sm:$0xff]  }
 0x2a7   : > { %v652_v47 = vpop.f32.mrb[8].mxu0 }
 0x2a8   : > { %v1246_v48 = vpop.f32.mrb[9].mxu0  ;;  %v658_v49 = vsel %vm493_vm3, %v652_v47, -inf }
 0x2a9   : > { %659 = vmax.xlane.f32.xlu1 %v658_v49  ;;  %v655_v50 = vpop.f32.mrb[10].mxu0 }
 0x2aa   : > { %v1247_v51 = vpop.f32.mrb[11].mxu0 }
 0x2af   : > { %v765_v52 = vpop.f32.mrb[12].mxu0 }
 0x2b0   : > { %v1258_v53 = vpop.f32.mrb[13].mxu0  ;;  %v771_v54 = vsel %vm493_vm3, %v765_v52, -inf }
 0x2b1   : > { %772 = vmax.xlane.f32.xlu0 %v771_v54  ;;  %v768_v55 = vpop.f32.mrb[14].mxu0 }
 0x2b2   : > { %v1259_v56 = vpop.f32.mrb[15].mxu0 }
 0x2b7   : > { %v878_v57 = vpop.f32.mrb[16].mxu0 }
 0x2b8   : > { %v1270_v58 = vpop.f32.mrb[17].mxu0  ;;  %v884_v59 = vsel %vm493_vm3, %v878_v57, -inf }
 0x2b9   : > { %885 = vmax.xlane.f32.xlu0 %v884_v59  ;;  %v881_v60 = vpop.f32.mrb[18].mxu0 }
 0x2ba   : > { %784 = vrot.lane.b32.xlu1 %v1864_v29, %s1591_s10  ;;  %v1271_v61 = vpop.f32.mrb[19].mxu0  ;;  %s343_s10 = scalar_lea.vmem [#allocation10], %s1166_s12 }
 0x2be   : > { %897 = vrot.lane.b32.xlu1 %v1864_v29, %s1592_s22  ;;  %s1053_s22 = sshll.u32 %s343_s10, 4  ;;  %s1938_s22 = int_to_ptr.vmem [resolvable:$true] %s1053_s22 }
 0x2bf   : > { %s1492_s9 = scalar_lea.vmem %s1938_s22, 128 }
 0x2c0   : > { %p1493_p8 = scmp.ne.s32.totalorder %s1938_s22, %s1492_s9 }
 0x2c1   : > { %v542_v62 = vpop.xlane.xlu0 %541 }
 0x2c2   : > { %v543_v63 = vsub.f32 %v534_v42, %v542_v62  ;;  %v1388_v42 = vld [vmem:[%s1991_s5] sm:$0xff]   ;;  %p1494_p1 = pnand %p1493_p8, %p2012_p2 }
 0x2c3   : > { %1279 = vmatpush3.bf16.msra.mxu0 %v1388_v42 }
 0x2c4   : > { %v544_v1 = vpack.c.bf16 %v543_v63, %v543_v63  ;;  %1280 = vmatprep.subr.bf16.mxu0 %v1585_v0  ;;  %p1495_p10 = pneg %p1494_p1 }
 0x2c6   : > { %v546_v2 = vmul.bf16 1069105081, %v544_v1 }
 0x2c7   : > { %1281 = vmatpush3.bf16.msra.mxu0 %v1389_v46 }
 0x2c8   : > { %1390 = vpow.bf16 %v546_v2 }
 0x2cf   : > { %671 = vrot.lane.b32.xlu0 %v1864_v29, %s1593_s18 }
 0x2d3   : > { %v1391_v3 = vpop.eup %1390 }
 0x2d4   : > { %1239 = vmatmul.mubr.msk.bf16.vlgmr.msra.gmra.mrb[4].mxu1 %vm493_vm3, %v1391_v3  ;;  %v548_v32 = vunpack.c.l.bf16 %v1391_v3 }
 0x2d5   : > { %1250 = vmatprep.mubr.msk.bf16.mxu1 %vm1586_vm1, %v1585_v0 }
 0x2d6   : > { %v549_v33 = vsel %vm493_vm3, %v548_v32, 0.0 }
 0x336   : > { %v660_v4 = vpop.xlane.xlu1 %659 }
 0x337   : > { %v661_v5 = vsub.f32 %v652_v47, %v660_v4 }
 0x339   : > { %v662_v6 = vpack.c.bf16 %v661_v5, %v661_v5 }
 0x33a   : > { %v785_v22 = vpop.permute.xlu1 %784 }
 0x33b   : > { %v664_v7 = vmul.bf16 1069105081, %v662_v6  ;;  %v790_v23 = vsel %vm561_vm4, %v785_v22, 0 }
 0x33d   : > { %1392 = vpow.bf16 %v664_v7 }
 0x33e   : > { %v773_v8 = vpop.xlane.xlu0 %772  ;;  %v898_v27 = vpop.permute.xlu1 %897 }
 0x33f   : > { %v774_v9 = vsub.f32 %v765_v52, %v773_v8  ;;  %v903_v28 = vsel %vm561_vm4, %v898_v27, 0 }
 0x341   : > { %v775_v10 = vpack.c.bf16 %v774_v9, %v774_v9 }
 0x343   : > { %v777_v12 = vmul.bf16 1069105081, %v775_v10  ;;  %v965_v10 = vld [vmem:[#allocation2] sm:$0xff] }
 0x345   : > { %1394 = vpow.bf16 %v777_v12  ;;  %v1030_v12 = vld [vmem:[%s1992_s6] sm:$0x1] }
 0x346   : > { %v886_v13 = vpop.xlane.xlu0 %885 }
 0x347   : > { %v887_v14 = vsub.f32 %v878_v57, %v886_v13 }
 0x348   : > { %v1393_v15 = vpop.eup %1392 }
 0x349   : > { %v888_v16 = vpack.c.bf16 %v887_v14, %v887_v14  ;;  %v666_v17 = vunpack.c.l.bf16 %v1393_v15 }
 0x34a   : > { %v672_v18 = vpop.permute.xlu0 %671 }
 0x34b   : > { %v890_v19 = vmul.bf16 1069105081, %v888_v16  ;;  %v677_v20 = vsel %vm561_vm4, %v672_v18, 0  ;;  %v667_v21 = vsel %vm493_vm3, %v666_v17, 0.0  ;;  %v1031_v17 = vunpack.c.l.bf16 %v1030_v12 }
 0x34c   : > { %668 = vadd.xlane.f32.xlu0 %v667_v21  ;;  %1249 = vmatpush3.bf16.msra.mxu1 %v677_v20 }
 0x34d   : > { %1396 = vpow.bf16 %v890_v19  ;;  %1260 = vmatprep.subr.bf16.mxu1 %v1585_v0  ;;  %v1035_v19 = vrot.slane %v1031_v17, %v1856_v11 }
 0x34f   : > { %1251 = vmatmul.mubr.msk.bf16.vlgmr.msra.gmra.mrb[8].mxu1 %vm493_vm3, %v1393_v15 }
 0x350   : > { %v1395_v24 = vpop.eup %1394  ;;  %1261 = vmatpush3.bf16.msra.mxu1 %v790_v23  ;;  %1262 = vmatprep.mubr.msk.bf16.mxu1 %vm1586_vm1, %v1585_v0 }
 0x351   : > { %v779_v25 = vunpack.c.l.bf16 %v1395_v24  ;;  %1272 = vmatprep.subr.bf16.mxu1 %v1585_v0 }
 0x353   : > { %v780_v26 = vsel %vm493_vm3, %v779_v25, 0.0 }
 0x354   : > { %781 = vadd.xlane.f32.xlu1 %v780_v26 }
 0x357   : > { %1263 = vmatmul.mubr.msk.bf16.vlgmr.msra.gmra.mrb[12].mxu1 %vm493_vm3, %v1395_v24 }
 0x358   : > { %v1397_v29 = vpop.eup %1396  ;;  %1273 = vmatpush3.bf16.msra.mxu1 %v903_v28  ;;  %1274 = vmatprep.mubr.msk.bf16.mxu1 %vm1586_vm1, %v1585_v0 }
 0x359   : > { %v892_v30 = vunpack.c.l.bf16 %v1397_v29 }
 0x35b   : > { %v893_v31 = vsel %vm493_vm3, %v892_v30, 0.0 }
 0x35c   : > { %894 = vadd.xlane.f32.xlu0 %v893_v31 }
 0x35f   : > { %1275 = vmatmul.mubr.msk.bf16.vlgmr.msra.gmra.mrb[16].mxu1 %vm493_vm3, %v1397_v29 }
 0x360   : > { %550 = vadd.xlane.f32.xlu0 %v549_v33 }
 0x3a7   : > { %v599_v34 = vpop.f32.mrb[4].mxu1 }
 0x3a8   : > { %v1240_v35 = vpop.f32.mrb[5].mxu1 }
 0x3a9   : > { %v602_v36 = vpop.f32.mrb[6].mxu1 }
 0x3aa   : > { %v1241_v37 = vpop.f32.mrb[7].mxu1 }
 0x3d9   : > { %v669_v38 = vpop.xlane.xlu0 %668 }
 0x3da   : > { %1398 = vrcp.f32 %v669_v38 }
 0x3e1   : > { %v782_v39 = vpop.xlane.xlu1 %781 }
 0x3e2   : > { %1400 = vrcp.f32 %v782_v39 }
 0x3e4   : > { %v1399_v40 = vpop.eup %1398 }
 0x3e9   : > { %v895_v47 = vpop.xlane.xlu0 %894 }
 0x3ea   : > { %1402 = vrcp.f32 %v895_v47 }
 0x3ec   : > { %v1401_v50 = vpop.eup %1400 }
 0x3ed   : > { %v551_v63 = vpop.xlane.xlu0 %550 }
 0x3ee   : > { %1404 = vrcp.f32 %v551_v63 }
 0x3f4   : > { %v1403_v57 = vpop.eup %1402 }
 0x3f8   : > { %v1405_v1 = vpop.eup %1404 }
 0x3f9   : > { %v605_v2 = vmul.f32 %v1405_v1, %v599_v34 }
 0x3fb   : > { %v606_v4 = vpack.c.bf16 %v605_v2, %v605_v2 }
 0x422   : > { %v713_v41 = vpop.f32.mrb[8].mxu1 }
 0x423   : > { %v719_v43 = vmul.f32 %v1399_v40, %v713_v41  ;;  %v1252_v44 = vpop.f32.mrb[9].mxu1 }
 0x424   : > { %v716_v45 = vpop.f32.mrb[10].mxu1 }
 0x425   : > { %v720_v48 = vpack.c.bf16 %v719_v43, %v719_v43  ;;  %v1253_v49 = vpop.f32.mrb[11].mxu1 }
 0x427   : > { %948 = vrot.lane.b32.xlu1 %v720_v48, %s1594_s11  ;;  %s1496_s11 = sshll.u32 %s1597_s27, 4  ;;  %s1497_s11 = int_to_ptr.vmem [resolvable:$false] %s1496_s11 }
 0x428   : > { %p1499_p3 = scmp.lt.s32.totalorder %s1938_s22, %s1497_s11 }
 0x42a   : > { %v826_v51 = vpop.f32.mrb[12].mxu1 }
 0x42b   : > { %v832_v52 = vmul.f32 %v1401_v50, %v826_v51  ;;  %v1264_v53 = vpop.f32.mrb[13].mxu1 }
 0x42c   : > { %v829_v54 = vpop.f32.mrb[14].mxu1 }
 0x42d   : > { %v833_v55 = vpack.c.bf16 %v832_v52, %v832_v52  ;;  %v1265_v56 = vpop.f32.mrb[15].mxu1 }
 0x42f   : > { %951 = vrot.lane.b32.xlu0 %v833_v55, %s1595_s13  ;;  %s1498_s13 = scalar_lea.vmem %s1497_s11, 256 }
 0x430   : > { %p1500_p5 = scmp.lt.s32.totalorder %s1498_s13, %s1492_s9 }
 0x432   : > { %v939_v58 = vpop.f32.mrb[16].mxu1  ;;  %p1501_p9 = por %p1500_p5, %p1499_p3 }
 0x433   : > { %v945_v59 = vmul.f32 %v1403_v57, %v939_v58  ;;  %v1276_v60 = vpop.f32.mrb[17].mxu1 }
 0x434   : > { %v942_v61 = vpop.f32.mrb[18].mxu1  ;;  %p1502_p11 = pnand %p1501_p9, %p1495_p10 }
 0x435   : > { %v946_v62 = vpack.c.bf16 %v945_v59, %v945_v59  ;;  %v1277_v0 = vpop.f32.mrb[19].mxu1 }
 0x437   : > { %954 = vrot.lane.b32.xlu1 %v946_v62, %s1596_s14 }
 0x499   : > { %v949_v3 = vpop.permute.xlu1 %948 }
 0x49a   : > { %v958_v6 = vsel %vm493_vm3, %v606_v4, %v949_v3 }
 0x4a1   : > { %v952_v5 = vpop.permute.xlu0 %951 }
 0x4a2   : > { %v961_v7 = vsel %vm959_vm5, %v958_v6, %v952_v5 }
 0x4a9   : > { %v955_v8 = vpop.permute.xlu1 %954 }
 0x4aa   : > { %v964_v9 = vsel %vm962_vm6, %v961_v7, %v955_v8 }
 0x4ab   : > { %1283 = vmatmul.mubr.msk.bf16.vlgmr.msra.gmra.mrb[20].mxu0 %vm372_vm0, %v964_v9 }
 0x57e   : > { %v1018_v13 = vpop.f32.mrb[20].mxu0 }
 0x57f   : > { %v1024_v14 = vadd.f32 %v1018_v13, %v965_v10  ;;  %v1284_v15 = vpop.f32.mrb[21].mxu0 }
 0x580   : > { %v1021_v16 = vpop.f32.mrb[22].mxu0 }
 0x581   : > { %1025 = vst.msk [vmem:[#allocation2] sm:$0xff] %vm372_vm0, %v1024_v14  ;;  %v1285_v18 = vpop.f32.mrb[23].mxu0 }
 0x588   : > { %v1029_v20 = vld [vmem:[#allocation2] sm:$0xff] }
 0x589   : > { %v1036_v21 = vadd.f32 %v1035_v19, %v1029_v20 }
 0x58b   : > { %1037 = vst.msk [vmem:[%s343_s10] sm:$0xff] %vm372_vm0, %v1036_v21 }
 0x58c   : > { %1505 = shalt.err (!%p1502_p11)
}
 0x58d   : > { %s1506_s21 = scalar_lea.hbm %s1936_s30, 128  ;;  %s1510_s24 = scalar_lea.hbm %s1993_s7, 256 }
 0x58e   : > { %p1507_p0 = scmp.ne.s32.totalorder %s1936_s30, %s1506_s21  ;;  %p1511_p6 = scmp.lt.u32.totalorder %s1936_s30, %s1993_s7 }
 0x58f   : > { %p1512_p7 = scmp.lt.u32.totalorder %s1510_s24, %s1506_s21  ;;  %p1514_p8 = scmp.lt.u32.totalorder %s1506_s21, %s1936_s30 }
 0x590   : > { %p1508_p4 = pnand %p1507_p0, %p2012_p2 }
 0x591   : > { %p1513_p12 = por %p1512_p7, %p1511_p6 }
 0x592   : > { %p1509_p13 = pneg %p1508_p4 }
 0x593   : > { %p1515_p1 = por %p1514_p8, %p1513_p12 }
 0x595   : > { %p1516_p10 = pnand %p1515_p1, %p1509_p13 }
 0x597   : > { %1519 = shalt.err (!%p1516_p10)
}
 0x598   : > { %1296 = dma.vmem_to_hbm [thread:$0]  (%p2012_p2), %s1938_s22, 128, %s1936_s30, %s1039_s8  }
 0x599 PF: > { %s2013_s10 = sld [smem:[#allocation14_spill]]  ;;  %s2014_s18 = sld [smem:[#allocation15_spill]] }
 0x59a   : > { %p2016_p5 = scmp.ge.s32.totalorder %s1578_s29, 2 }
 0x59f   : > { %s1065_s17 = sand.u32 1, %s2013_s10   ;;  %p2015_p3 = scmp.ne.s32.totalorder %s2014_s18, 0 }
 0x5a0   : > { %s1066_s9 = scalar_lea.sflag [#allocation6], %s1065_s17 }
 0x5a1   : > { %p1310_p9 = pnand %p2016_p5, %p2015_p3 }
 0x5a3   : > { %1553 = dma.done.wait (!%p1310_p9), %s1066_s9, 128  }
 0x5a4   : > { %1555 = vsyncadd (!%p1310_p9), %s1066_s9, 4294967168  ;;  %s24_s29 = sadd.s32 1, %s1578_s29   ;;  %s2017_s24 = smov %s1562_s25 }
 0x5a5   : > { %p21_p11 = scmp.ge.s32.totalorder %s24_s29, 4   ;;  %s2018_s25 = smov %s1566_s26 }
 0x5a6   : > { %s2019_s26 = smov %s1780_s19  ;;  %s2020_s27 = smov %s1574_s28 }
 0x5a7   : > { %s2021_s28 = smov %s2023_s20  ;;  %23 = sbr.rel (!%p21_p11) target bundleno = 7 (0x7), region = 113 }
 0x5ae   :  { %1071 = vsyncpa [#allocation5], 1 }
 0x5af   :  { %1073 = vsyncpa [#allocation5 + $0x1], 1 }
 0x5b0   :  { %1074 = vsyncpa [#allocation8], 1 }
 0x5b1   :  { %1075 = vsyncpa [#allocation6], 1 }
 0x5b2   :  { %1077 = vsyncpa [#allocation6 + $0x1], 1 }

</bundles_post_ra>
